<compile_context>
chip_gen: v6e
topology: v6e:2x2x1
jax: 0.10.0
libtpu: 0.0.40
codegen_flags: <defaults>
</compile_context>

<pallas_src>
import functools

import jax
import jax.numpy as jnp
from jax.experimental import pallas as pl
from jax.experimental.pallas import tpu as pltpu

ALPHA = 0.05     # module default
EPS = 1e-4
LANE = 128       # lane width
SUBLANE = 8      # sublane tile


def _tpu_kind():
    try:
        return jax.devices()[0].device_kind.lower()
    except Exception:
        return ""


def _gen_config():
    """Returns (max_row_tile, nsplit) tuned per TPU generation."""
    kind = _tpu_kind()
    if "v7" in kind:
        # 64 MiB physical VMEM, 2 TensorCores: 4 MiB/input block, split grid.
        return 8192, 2
    if "v5 lite" in kind or "v5e" in kind or "v5lite" in kind:
        # v5e (16 MiB default scoped VMEM): 2 MiB/input block, 8 MiB
        # double-buffered for the two inputs; vmem_limit below adds headroom.
        return 4096, 1
    # v6e / v5p / v4 / unknown: 128 MiB VMEM class, single TensorCore.
    return 8192, 1


def _chain_sum(r):
    """Sum an (n, 8, 128) array over axis 0 as a few independent add chains."""
    n = r.shape[0]
    if n >= 8 and n % 4 == 0:
        q = n // 4
        return ((r[:q].sum(axis=0) + r[q:2 * q].sum(axis=0)) +
                (r[2 * q:3 * q].sum(axis=0) + r[3 * q:].sum(axis=0)))
    if n >= 4 and n % 2 == 0:
        h = n // 2
        return r[:h].sum(axis=0) + r[h:].sum(axis=0)
    return r.sum(axis=0)


def _bceblur_kernel(pred_ref, true_ref, out_ref, *, inv_denom, num_blocks,
                    valid_rows_last):
    s = pl.program_id(0)
    i = pl.program_id(1)
    blk = s * pl.num_programs(1) + i

    @pl.when(i == 0)
    def _init():
        out_ref[...] = jnp.zeros_like(out_ref)

    def accumulate(valid_rows):
        x = pred_ref[...].astype(jnp.float32)   # logits
        z = true_ref[...].astype(jnp.float32)   # targets

        # One exp serves both sigmoid and the BCE log term.
        ax = jnp.abs(x)
        e = jnp.exp(-ax)                               # EUP exp
        sig_abs = pl.reciprocal(1.0 + e)               # sigmoid(|x|), EUP recip
        p = jnp.where(x >= 0.0, sig_abs, 1.0 - sig_abs)  # sigmoid(x)

        # Stable BCE-with-logits: max(x,0) - x*z + log1p(exp(-|x|)).
        bce = jnp.maximum(x, 0.0) - x * z + jnp.log1p(e)   # EUP log1p

        dx = p - z
        alpha_factor = 1.0 - jnp.exp((dx - 1.0) * inv_denom)  # EUP exp
        loss = bce * alpha_factor

        if valid_rows is not None:  # traced only for the partial last block
            row_idx = jax.lax.broadcasted_iota(jnp.int32, loss.shape, 0)
            loss = jnp.where(row_idx < valid_rows, loss, 0.0)

        n_rows = loss.shape[0]
        pad = (-n_rows) % SUBLANE
        if pad:  # tiny single-block inputs only
            loss = jnp.concatenate(
                [loss, jnp.zeros((pad, LANE), jnp.float32)], axis=0)
        r = loss.reshape(-1, SUBLANE, LANE)
        out_ref[...] += _chain_sum(r)[None]

    if valid_rows_last is None:
        @pl.when(blk < num_blocks)
        def _full():
            accumulate(None)
    else:
        @pl.when(blk < num_blocks - 1)
        def _bulk():
            accumulate(None)

        @pl.when(blk == num_blocks - 1)
        def _last():
            accumulate(valid_rows_last)


def bceblur_loss(pred, true, alpha=ALPHA):
    """pred, true: float arrays of identical shape. Returns scalar mean loss."""
    assert pred.shape == true.shape
    total = pred.size
    assert total > 0

    max_row_tile, nsplit = _gen_config()

    flat_pred = pred.reshape(-1)
    flat_true = true.reshape(-1)

    lane_pad = (-total) % LANE
    if lane_pad:
        # Rare ragged-lane fallback: pad < 128 sentinel elements. pred=0 and
        # true=-0.5 make alpha_factor exactly 0, so the pad contributes
        # exactly 0 (no in-kernel element mask needed). XLA materializes one
        # padded copy here; the common case (numel % 128 == 0) is zero-copy.
        flat_pred = jnp.concatenate(
            [flat_pred, jnp.zeros((lane_pad,), flat_pred.dtype)])
        flat_true = jnp.concatenate(
            [flat_true, jnp.full((lane_pad,), -0.5, flat_true.dtype)])

    rows = (total + lane_pad) // LANE
    pred2d = flat_pred.reshape(rows, LANE)
    true2d = flat_true.reshape(rows, LANE)

    # Row tile: a multiple of 8 no larger than the array (full extent for tiny
    # inputs), so all blocks but possibly the last are full; the last partial
    # block is masked in-kernel under pl.when (no HBM-side padding).
    if rows <= max_row_tile:
        row_tile = rows if rows <= SUBLANE else (rows // SUBLANE) * SUBLANE
    else:
        row_tile = max_row_tile
    num_blocks = pl.cdiv(rows, row_tile)
    nsplit = max(1, min(nsplit, num_blocks))
    steps = pl.cdiv(num_blocks, nsplit)

    valid_rows_last = None
    if rows % row_tile != 0:
        valid_rows_last = rows - (num_blocks - 1) * row_tile

    if nsplit == 1:
        in_map = lambda s, i: (i, 0)
    else:
        # Clamp so the (at most one) overhanging step of the last split
        # re-reads a valid block; the kernel skips its accumulation.
        in_map = lambda s, i: (jnp.minimum(s * steps + i, num_blocks - 1), 0)

    kernel = functools.partial(
        _bceblur_kernel,
        inv_denom=float(1.0 / (alpha + EPS)),
        num_blocks=num_blocks,
        valid_rows_last=valid_rows_last,
    )

    partial_sums = pl.pallas_call(
        kernel,
        out_shape=jax.ShapeDtypeStruct((nsplit, SUBLANE, LANE), jnp.float32),
        grid_spec=pltpu.PrefetchScalarGridSpec(
            num_scalar_prefetch=0,
            grid=(nsplit, steps),
            in_specs=[
                pl.BlockSpec((row_tile, LANE), in_map),
                pl.BlockSpec((row_tile, LANE), in_map),
            ],
            out_specs=pl.BlockSpec((1, SUBLANE, LANE), lambda s, i: (s, 0, 0)),
        ),
        compiler_params=pltpu.CompilerParams(
            # TODO(synk): on v7x switch axis 0 to pltpu.CORE_PARALLEL (or a
            # core_map split) if xprof shows only one TensorCore streaming.
            dimension_semantics=("parallel", "arbitrary"),
            # <= physical VMEM on every generation (v7x: 64 MiB, others: 128).
            vmem_limit_bytes=48 * 1024 * 1024,
        ),
    )(pred2d, true2d)

    # Single cross-lane/sublane reduction + mean, once, outside the grid loop.
    return jnp.sum(partial_sums) / jnp.float32(total)


def _bceblur_ref(pred, true, alpha=ALPHA):
    x = pred.astype(jnp.float32)
    z = true.astype(jnp.float32)
    bce = jnp.maximum(x, 0.0) - x * z + jnp.log1p(jnp.exp(-jnp.abs(x)))
    p = jax.nn.sigmoid(x)
    af = 1.0 - jnp.exp((p - z - 1.0) / (alpha + EPS))
    return jnp.mean(bce * af)


if __name__ == "__main__":
    key = jax.random.PRNGKey(0)
    k1, k2, k3, k4 = jax.random.split(key, 4)

    # NCHW objectness/cls map: batch=2, channels=4, spatial=16x16.
    pred = jax.random.normal(k1, (2, 4, 16, 16), dtype=jnp.float32) * 2.0
    true = (jax.random.uniform(k2, (2, 4, 16, 16)) > 0.7).astype(jnp.float32)
    out = jax.block_until_ready(bceblur_loss(pred, true))
    ref = _bceblur_ref(pred, true)
    assert jnp.allclose(out, ref, rtol=1e-4, atol=1e-6), (out, ref)

    # Ragged shape: exercises the partial-last-block mask + sentinel lane pad.
    pred2 = jax.random.normal(k3, (3, 5, 7, 11), dtype=jnp.float32) * 2.0
    true2 = (jax.random.uniform(k4, (3, 5, 7, 11)) > 0.5).astype(jnp.float32)
    out2 = jax.block_until_ready(bceblur_loss(pred2, true2))
    ref2 = _bceblur_ref(pred2, true2)
    assert jnp.allclose(out2, ref2, rtol=1e-4, atol=1e-6), (out2, ref2)

    print("KERNEL_OK")
</pallas_src>

<mosaic_0001>
module attributes {stable_mosaic.version = 11 : i64} {
  func.func @_bceblur_kernel(%arg0: i32, %arg1: i32, %arg2: memref<16x128xf32, #tpu.memory_space<vmem>>, %arg3: memref<16x128xf32, #tpu.memory_space<vmem>>, %arg4: memref<1x8x128xf32, #tpu.memory_space<vmem>>) attributes {dimension_semantics = [#tpu.dimension_semantics<parallel>, #tpu.dimension_semantics<arbitrary>], iteration_bounds = array<i64: 1, 1>, scalar_prefetch = 0 : i64, scratch_operands = 0 : i64, tpu.core_type = #tpu.core_type<tc>, window_params = [{transform_indices = @transform_0, window_bounds = array<i64: 16, 128>}, {transform_indices = @transform_1, window_bounds = array<i64: 16, 128>}, {transform_indices = @transform_2, window_bounds = array<i64: 1, 8, 128>}]} {
    %c1_i32 = arith.constant 1 : i32
    %0 = arith.muli %arg0, %c1_i32 : i32
    %1 = arith.addi %0, %arg1 : i32
    %c0_i32 = arith.constant 0 : i32
    %2 = arith.cmpi eq, %arg1, %c0_i32 : i32
    %3 = arith.extui %2 : i1 to i32
    %c0_i32_0 = arith.constant 0 : i32
    %4 = arith.cmpi ne, %3, %c0_i32_0 : i32
    scf.if %4 {
      %cst = arith.constant 0.000000e+00 : f32
      %8 = vector.broadcast %cst : f32 to vector<1x8x128xf32>
      %c0 = arith.constant 0 : index
      %c0_3 = arith.constant 0 : index
      %c0_4 = arith.constant 0 : index
      %9 = vector.load %arg4[%c0, %c0_3, %c0_4] : memref<1x8x128xf32, #tpu.memory_space<vmem>>, vector<1x8x128xf32>
      tpu.vector_store %arg4[%c0, %c0_3, %c0_4], %8 {strides = array<i32>} : memref<1x8x128xf32, #tpu.memory_space<vmem>>, vector<1x8x128xf32>,
    } else {
    }
    %c1_i32_1 = arith.constant 1 : i32
    %5 = arith.cmpi slt, %1, %c1_i32_1 : i32
    %6 = arith.extui %5 : i1 to i32
    %c0_i32_2 = arith.constant 0 : i32
    %7 = arith.cmpi ne, %6, %c0_i32_2 : i32
    scf.if %7 {
      %c0 = arith.constant 0 : index
      %c0_3 = arith.constant 0 : index
      %8 = vector.load %arg2[%c0, %c0_3] : memref<16x128xf32, #tpu.memory_space<vmem>>, vector<16x128xf32>
      %c0_4 = arith.constant 0 : index
      %c0_5 = arith.constant 0 : index
      %9 = vector.load %arg3[%c0_4, %c0_5] : memref<16x128xf32, #tpu.memory_space<vmem>>, vector<16x128xf32>
      %10 = math.absf %8 : vector<16x128xf32>
      %cst = arith.constant 0.000000e+00 : f32
      %11 = vector.broadcast %cst : f32 to vector<16x128xf32>
      %12 = arith.subf %11, %10 : vector<16x128xf32>
      %13 = math.exp %12 : vector<16x128xf32>
      %cst_6 = arith.constant 1.000000e+00 : f32
      %14 = vector.broadcast %cst_6 : f32 to vector<16x128xf32>
      %15 = arith.addf %14, %13 : vector<16x128xf32>
      %16 = tpu.reciprocal %15 : vector<16x128xf32> -> vector<16x128xf32>
      %cst_7 = arith.constant 0.000000e+00 : f32
      %17 = vector.broadcast %cst_7 : f32 to vector<16x128xf32>
      %18 = arith.cmpf oge, %8, %17 : vector<16x128xf32>
      %cst_8 = arith.constant 1.000000e+00 : f32
      %19 = vector.broadcast %cst_8 : f32 to vector<16x128xf32>
      %20 = arith.subf %19, %16 : vector<16x128xf32>
      %21 = arith.select %18, %16, %20 : vector<16x128xi1>, vector<16x128xf32>
      %cst_9 = arith.constant 0.000000e+00 : f32
      %22 = vector.broadcast %cst_9 : f32 to vector<16x128xf32>
      %23 = arith.maximumf %8, %22 : vector<16x128xf32>
      %24 = arith.mulf %8, %9 : vector<16x128xf32>
      %25 = arith.subf %23, %24 : vector<16x128xf32>
      %26 = math.log1p %13 : vector<16x128xf32>
      %27 = arith.addf %25, %26 : vector<16x128xf32>
      %28 = arith.subf %21, %9 : vector<16x128xf32>
      %cst_10 = arith.constant 1.000000e+00 : f32
      %29 = vector.broadcast %cst_10 : f32 to vector<16x128xf32>
      %30 = arith.subf %28, %29 : vector<16x128xf32>
      %cst_11 = arith.constant 19.9600792 : f32
      %31 = vector.broadcast %cst_11 : f32 to vector<16x128xf32>
      %32 = arith.mulf %30, %31 : vector<16x128xf32>
      %33 = math.exp %32 : vector<16x128xf32>
      %cst_12 = arith.constant 1.000000e+00 : f32
      %34 = vector.broadcast %cst_12 : f32 to vector<16x128xf32>
      %35 = arith.subf %34, %33 : vector<16x128xf32>
      %36 = arith.mulf %27, %35 : vector<16x128xf32>
      %37 = vector.shape_cast %36 : vector<16x128xf32> to vector<2x8x128xf32>
      %c0_13 = arith.constant 0 : index
      %c0_14 = arith.constant 0 : index
      %c0_15 = arith.constant 0 : index
      %38 = vector.load %arg4[%c0_13, %c0_14, %c0_15] : memref<1x8x128xf32, #tpu.memory_space<vmem>>, vector<1x8x128xf32>
      %cst_16 = arith.constant dense<0.000000e+00> : vector<8x128xf32>
      %39 = vector.multi_reduction <add>, %37, %cst_16 [0] : vector<2x8x128xf32> to vector<8x128xf32>
      %40 = vector.shape_cast %39 : vector<8x128xf32> to vector<1x8x128xf32>
      %41 = arith.addf %38, %40 : vector<1x8x128xf32>
      %c0_17 = arith.constant 0 : index
      %c0_18 = arith.constant 0 : index
      %c0_19 = arith.constant 0 : index
      %42 = vector.load %arg4[%c0_17, %c0_18, %c0_19] : memref<1x8x128xf32, #tpu.memory_space<vmem>>, vector<1x8x128xf32>
      tpu.vector_store %arg4[%c0_17, %c0_18, %c0_19], %41 {strides = array<i32>} : memref<1x8x128xf32, #tpu.memory_space<vmem>>, vector<1x8x128xf32>,
    } else {
    }
    return
  }
  func.func @transform_0(%arg0: i32, %arg1: i32) -> (i32, i32) {
    %c0_i32 = arith.constant 0 : i32
    %c0_i32_0 = arith.constant 0 : i32
    return %arg1, %c0_i32 : i32, i32
  }
  func.func @transform_1(%arg0: i32, %arg1: i32) -> (i32, i32) {
    %c0_i32 = arith.constant 0 : i32
    %c0_i32_0 = arith.constant 0 : i32
    return %arg1, %c0_i32 : i32, i32
  }
  func.func @transform_2(%arg0: i32, %arg1: i32) -> (i32, i32, i32) {
    %c0_i32 = arith.constant 0 : i32
    %c0_i32_0 = arith.constant 0 : i32
    %c0_i32_1 = arith.constant 0 : i32
    return %arg0, %c0_i32, %c0_i32_0 : i32, i32, i32
  }
}

</mosaic_0001>

<bundles_post_ra>
// kernel: tpu_custom_call.1
= control target key start
LH: loop header
LB: loop body
LE: loop exit
PB: predicated region body
PF: predicated region fallthrough
CT: control target
= control target key end

     0   :  { %7 = vsyncpa [#allocation3], 0  ;;  %s251_s0 = inlined_call_operand.hbm [shape: f32[16,128], index: 0, kind: input, shape index: {}]   ;;  %s252_s1 = inlined_call_operand.hbm [shape: f32[16,128], index: 1, kind: input, shape index: {}]   ;;  %s253_s2 = inlined_call_operand.hbm [shape: f32[1,8,128], index: 2, kind: output, shape index: {}]  }
   0x1   :  { %8 = vsyncpa [#allocation6], 0 }
   0x2   :  { %9 = vsyncpa [#allocation4], 0  ;;  %s222_s9 = smov [#allocation2]  }
   0x3   :  { %s15_s10 = sshll.u32 %s222_s9, 4  ;;  %s16_s10 = int_to_ptr.vmem [resolvable:$true] %s15_s10 }
   0x4   :  { %s164_s11 = scalar_lea.vmem %s16_s10, 256  ;;  %p169_p1 = scmp.lt.s32.totalorder %s16_s10, %s16_s10 }
   0x5   :  { %p165_p0 = scmp.ne.s32.totalorder %s16_s10, %s164_s11  ;;  %p170_p2 = scmp.lt.s32.totalorder %s164_s11, %s164_s11 }
   0x7   :  { %p171_p3 = por %p170_p2, %p169_p1 }
   0x9   :  { %p172_p4 = pnand %p171_p3, %p165_p0 }
   0xb   :  { %175 = shalt.err (!%p172_p4)
}
   0xc   :  { %s223_s12 = smov 128   ;;  %s224_s13 = smov 8  }
   0xd   :  { %21 = dma.hbm_to_vmem [thread:$0]  %s251_s0, 256, %s16_s10, [#allocation3], %s223_s12, %s223_s12, %s224_s13  }
   0xe   :  { %s225_s16 = smov [#allocation5]  }
   0xf   :  { %s27_s17 = sshll.u32 %s225_s16, 4  ;;  %s28_s17 = int_to_ptr.vmem [resolvable:$true] %s27_s17 }
  0x10   :  { %s184_s18 = scalar_lea.vmem %s28_s17, 256  ;;  %p189_p6 = scmp.lt.s32.totalorder %s28_s17, %s28_s17 }
  0x11   :  { %p185_p5 = scmp.ne.s32.totalorder %s28_s17, %s184_s18  ;;  %p190_p7 = scmp.lt.s32.totalorder %s184_s18, %s184_s18 }
  0x13   :  { %p191_p8 = por %p190_p7, %p189_p6 }
  0x15   :  { %p192_p9 = pnand %p191_p8, %p185_p5 }
  0x17   :  { %195 = shalt.err (!%p192_p9)
}
  0x18   :  { %33 = dma.hbm_to_vmem [thread:$0]  %s252_s1, 256, %s28_s17, [#allocation6], %s223_s12, %s223_s12, %s224_s13  }
  0x19   :  { %216 = dma.done.wait [#allocation3], 256  }
  0x1a   :  { %217 = vsyncadd [#allocation3], 4294967040 }
  0x1b   :  { %218 = dma.done.wait [#allocation6], 256  }
  0x1c   :  { %219 = vsyncadd [#allocation6], 4294967040  ;;  %v50_v0 = vld [vmem:[#allocation2] sm:$0xff]  ;;  %v51_v1 = vld [vmem:[#allocation2 + $0x8] sm:$0xff]  ;;  %s226_s0 = smov [#allocation7]  }
  0x1d   :  { %v54_v2 = vand.u32 2147483647, %v50_v0  ;;  %v55_v3 = vand.u32 2147483647, %v51_v1  ;;  %vm66_vm0 = vcmp.ge.f32.partialorder %v50_v0, 0.0  ;;  %v52_v14 = vld [vmem:[#allocation5] sm:$0xff] }
  0x1e   :  { %vm67_vm1 = vcmp.ge.f32.partialorder %v51_v1, 0.0  ;;  %v53_v16 = vld [vmem:[#allocation5 + $0x8] sm:$0xff]  ;;  %v72_v36 = vmax.f32 %v50_v0, 0.0  ;;  %v74_v37 = vmul.f32 %v52_v14, %v50_v0  ;;  %v73_v38 = vmax.f32 %v51_v1, 0.0  ;;  %s122_s1 = sshll.u32 %s226_s0, 4  ;;  %s123_s1 = int_to_ptr.vmem [resolvable:$true] %s122_s1 }
  0x1f   :  { %v56_v4 = vsub.f32 0.0, %v54_v2  ;;  %v57_v5 = vsub.f32 0.0, %v55_v3  ;;  %v75_v39 = vmul.f32 %v53_v16, %v51_v1  ;;  %s196_s21 = scalar_lea.vmem %s123_s1, 128  ;;  %p201_p11 = scmp.lt.s32.totalorder %s123_s1, %s123_s1 }
  0x20   :  { %v76_v44 = vsub.f32 %v72_v36, %v74_v37  ;;  %p197_p10 = scmp.ne.s32.totalorder %s123_s1, %s196_s21  ;;  %p202_p12 = scmp.lt.s32.totalorder %s196_s21, %s196_s21 }
  0x21   :  { %v58_v6 = vmul.f32 1.442695, %v56_v4  ;;  %v60_v7 = vmul.f32 1.442695, %v57_v5  ;;  %v77_v45 = vsub.f32 %v73_v38, %v75_v39 }
  0x22   :  { %p203_p13 = por %p202_p12, %p201_p11 }
  0x23   :  { %140 = vpow2.f32 %v58_v6 }
  0x24   :  { %142 = vpow2.f32 %v60_v7  ;;  %p204_p0 = pnand %p203_p13, %p197_p10 }
  0x30   :  { %v141_v8 = vpop.eup %140 }
  0x31   :  { %v143_v9 = vpop.eup %142  ;;  %v62_v10 = vadd.f32 1.0, %v141_v8  ;;  %v81_v25 = vmul.f32 -0.5, %v141_v8  ;;  %v84_v32 = vand.u32 2147483647, %v141_v8 }
  0x32   :  { %v63_v11 = vadd.f32 1.0, %v143_v9  ;;  %v90_v27 = vmul.f32 -0.5, %v143_v9  ;;  %v93_v35 = vand.u32 2147483647, %v143_v9 }
  0x33   :  { %144 = vrcp.f32 %v62_v10  ;;  %v82_v30 = vadd.f32 1.0, %v81_v25  ;;  %vm85_vm2 = vcmp.lt.f32.partialorder %v84_v32, 0.0004427343 }
  0x34   :  { %146 = vrcp.f32 %v63_v11  ;;  %v91_v33 = vadd.f32 1.0, %v90_v27  ;;  %vm94_vm3 = vcmp.lt.f32.partialorder %v93_v35, 0.0004427343 }
  0x35   :  { %148 = vlog2.f32 %v62_v10  ;;  %v83_v41 = vmul.f32 %v141_v8, %v82_v30 }
  0x36   :  { %150 = vlog2.f32 %v63_v11  ;;  %v92_v43 = vmul.f32 %v143_v9, %v91_v33 }
  0x40   :  { %v145_v12 = vpop.eup %144 }
  0x41   :  { %v147_v13 = vpop.eup %146  ;;  %v68_v15 = vsub.f32 1.0, %v145_v12 }
  0x42   :  { %v69_v17 = vsub.f32 1.0, %v147_v13  ;;  %v149_v31 = vpop.eup %148 }
  0x43   :  { %v70_v18 = vsel %vm66_vm0, %v145_v12, %v68_v15  ;;  %v151_v34 = vpop.eup %150  ;;  %v80_v40 = vmul.f32 0.6931472, %v149_v31 }
  0x44   :  { %v71_v19 = vsel %vm67_vm1, %v147_v13, %v69_v17  ;;  %v98_v20 = vsub.f32 %v70_v18, %v52_v14  ;;  %v89_v42 = vmul.f32 0.6931472, %v151_v34 }
  0x45   :  { %v99_v21 = vsub.f32 %v71_v19, %v53_v16  ;;  %v86_v46 = vsel %vm85_vm2, %v83_v41, %v80_v40 }
  0x46   :  { %v132_v22 = vadd.f32 -1.0, %v98_v20  ;;  %v95_v47 = vsel %vm94_vm3, %v92_v43, %v89_v42  ;;  %v96_v48 = vadd.f32 %v86_v46, %v76_v44 }
  0x47   :  { %v133_v23 = vadd.f32 -1.0, %v99_v21  ;;  %v97_v50 = vadd.f32 %v95_v47, %v77_v45 }
  0x48   :  { %v102_v24 = vmul.f32 19.96008, %v132_v22 }
  0x49   :  { %v103_v26 = vmul.f32 19.96008, %v133_v23 }
  0x4a   :  { %v104_v28 = vmul.f32 1.442695, %v102_v24 }
  0x4b   :  { %v106_v29 = vmul.f32 1.442695, %v103_v26 }
  0x4c   :  { %152 = vpow2.f32 %v104_v28 }
  0x4d   :  { %154 = vpow2.f32 %v106_v29 }
  0x59   :  { %v153_v49 = vpop.eup %152 }
  0x5a   :  { %v155_v51 = vpop.eup %154  ;;  %v108_v52 = vsub.f32 1.0, %v153_v49 }
  0x5b   :  { %v109_v53 = vsub.f32 1.0, %v155_v51 }
  0x5c   :  { %v110_v54 = vmul.f32 %v108_v52, %v96_v48 }
  0x5d   :  { %v111_v55 = vmul.f32 %v109_v53, %v97_v50 }
  0x5f   :  { %v113_v56 = vadd.f32 %v111_v55, %v110_v54 }
  0x61   :  { %115 = vst [vmem:[#allocation7] sm:$0xff] %v113_v56 }
  0x62   :  { %207 = shalt.err (!%p204_p0)
}
  0x63   :  { %125 = dma.vmem_to_hbm [thread:$0]  %s123_s1, 128, %s253_s2, [#allocation4]  }
  0x64   :  { %220 = dma.done.wait [#allocation4], 128  }
  0x65   :  { %221 = vsyncadd [#allocation4], 4294967168 }
  0x66   :  { %129 = vsyncpa [#allocation3], 1 }
  0x67   :  { %130 = vsyncpa [#allocation6], 1 }
  0x68   :  { %131 = vsyncpa [#allocation4], 1 }

</bundles_post_ra>
